<compile_context>
chip_gen: v5e
topology: v5e:2x2
jax: 0.10.0
libtpu: 0.0.40
codegen_flags: <defaults>
</compile_context>

<pallas_src>
import functools

import jax
import jax.numpy as jnp
from jax.experimental import pallas as pl
from jax.experimental.pallas import tpu as pltpu


def _linear_bn_lrelu_kernel(x_ref, w_ref, p_ref, o_ref, acc_ref, *,
                            eps, neg_slope):
    # x_ref:   [N, TK]   batch x (tile of) input features
    # w_ref:   [TK, TN]  (tile of) input features x (tile of) output features
    # p_ref:   [2, TN]   row 0 = gamma, row 1 = beta
    # o_ref:   [N, TN]   output tile
    # acc_ref: [N, TN]   f32 matmul accumulator (VMEM scratch)
    ki = pl.program_id(1)

    @pl.when(ki == 0)
    def _():
        acc_ref[...] = jnp.zeros_like(acc_ref)

    acc_ref[...] += jnp.dot(x_ref[...], w_ref[...],
                            preferred_element_type=jnp.float32)

    @pl.when(ki == pl.num_programs(1) - 1)
    def _():
        y = acc_ref[...]                                    # [N, TN] f32
        # BatchNorm1d (training mode): biased batch stats in one pass.
        mean = jnp.mean(y, axis=0, keepdims=True)           # [1, TN]
        mean_sq = jnp.mean(y * y, axis=0, keepdims=True)    # [1, TN]
        var = jnp.maximum(mean_sq - mean * mean, 0.0)
        gamma = p_ref[0:1, :]
        beta = p_ref[1:2, :]
        scale = gamma * jax.lax.rsqrt(var + eps)            # [1, TN]
        shift = beta - mean * scale                         # [1, TN]
        y_bn = y * scale + shift                            # 2 passes over tile
        o_ref[...] = jnp.where(y_bn >= 0, y_bn,
                               neg_slope * y_bn).astype(o_ref.dtype)


def _pad_axis(a, axis, multiple):
    pad = (-a.shape[axis]) % multiple
    if pad == 0:
        return a
    widths = [(0, 0)] * a.ndim
    widths[axis] = (0, pad)
    return jnp.pad(a, widths)


def linear_block_forward(x, weight, bias, gamma, beta, *,
                         eps=1e-5, neg_slope=0.2, tile_n=256, tile_k=512):
    """x: [N, in_size]; weight: [out_size, in_size] (PyTorch layout);
    bias/gamma/beta: [out_size]. Returns [N, out_size] float32.

    `bias` is accepted for interface parity with nn.Linear but unused:
    training-mode BatchNorm's mean subtraction cancels it exactly.
    """
    del bias
    n, k = x.shape
    m = weight.shape[0]
    assert weight.shape == (m, k)

    w_t = weight.T                                                  # [K, M]
    params = jnp.stack([gamma, beta], axis=0).astype(jnp.float32)   # [2, M]

    # Output-feature tiling. Zero-padded tail columns produce exact zeros and
    # are sliced off at the end.
    tn = m if m <= tile_n else tile_n
    if m > tile_n:
        w_t = _pad_axis(w_t, 1, tn)
        params = _pad_axis(params, 1, tn)
    m_p = w_t.shape[1]

    # Reduction (input-feature) tiling. Zero padding does not change x @ W.
    tk = k if k <= tile_k else tile_k
    if k > tile_k:
        x = _pad_axis(x, 1, tk)
        w_t = _pad_axis(w_t, 0, tk)
    k_p = w_t.shape[0]

    grid = (m_p // tn, k_p // tk)

    # VMEM footprint estimate: double-buffered inputs/output + accumulator.
    est = (2 * n * tk * x.dtype.itemsize
           + 2 * tk * tn * w_t.dtype.itemsize
           + 2 * 2 * tn * 4
           + 2 * n * tn * 4
           + n * tn * 4)
    compiler_kwargs = dict(dimension_semantics=("parallel", "arbitrary"))
    if est > 16 * 1024 * 1024:
        compiler_kwargs["vmem_limit_bytes"] = min(int(est * 1.5),
                                                  64 * 1024 * 1024)

    kernel = functools.partial(_linear_bn_lrelu_kernel,
                               eps=eps, neg_slope=neg_slope)

    out = pl.pallas_call(
        kernel,
        out_shape=jax.ShapeDtypeStruct((n, m_p), jnp.float32),
        grid_spec=pltpu.PrefetchScalarGridSpec(
            num_scalar_prefetch=0,
            grid=grid,
            in_specs=[
                pl.BlockSpec((n, tk), lambda j, ki: (0, ki)),    # x tile
                pl.BlockSpec((tk, tn), lambda j, ki: (ki, j)),   # W^T tile
                pl.BlockSpec((2, tn), lambda j, ki: (0, j)),     # gamma/beta
            ],
            out_specs=pl.BlockSpec((n, tn), lambda j, ki: (0, j)),
            scratch_shapes=[pltpu.VMEM((n, tn), jnp.float32)],
        ),
        compiler_params=pltpu.CompilerParams(**compiler_kwargs),
    )(x, w_t, params)

    return out[:, :m] if m_p != m else out


def _reference(x, weight, bias, gamma, beta, eps=1e-5, neg_slope=0.2):
    y = x @ weight.T + bias
    mean = jnp.mean(y, axis=0, keepdims=True)
    var = jnp.mean((y - mean) ** 2, axis=0, keepdims=True)
    y = (y - mean) / jnp.sqrt(var + eps) * gamma + beta
    return jnp.where(y >= 0, y, neg_slope * y)


if __name__ == "__main__":
    # Small shapes consistent with the module's forward: x is [batch, in_size].
    batch, in_size, out_size = 16, 64, 256

    key = jax.random.PRNGKey(0)
    kx, kw, kb = jax.random.split(key, 3)

    x = jax.random.normal(kx, (batch, in_size), dtype=jnp.float32)

    # Deterministic parameter init (PyTorch-style uniform bound for Linear).
    bound = 1.0 / (in_size ** 0.5)
    weight = jax.random.uniform(kw, (out_size, in_size), jnp.float32,
                                minval=-bound, maxval=bound)
    bias = jax.random.uniform(kb, (out_size,), jnp.float32,
                              minval=-bound, maxval=bound)
    gamma = jnp.ones((out_size,), jnp.float32)   # BatchNorm1d weight init
    beta = jnp.zeros((out_size,), jnp.float32)   # BatchNorm1d bias init

    out = linear_block_forward(x, weight, bias, gamma, beta)
    out = jax.block_until_ready(out)

    ref = _reference(x, weight, bias, gamma, beta)
    assert out.shape == (batch, out_size)
    assert jnp.allclose(out, ref, atol=1e-4, rtol=1e-4), (
        float(jnp.max(jnp.abs(out - ref))))

    print("KERNEL_OK")
</pallas_src>

<mosaic_0001>
module attributes {stable_mosaic.version = 11 : i64} {
  func.func @_linear_bn_lrelu_kernel(%arg0: i32, %arg1: i32, %arg2: memref<16x64xf32, #tpu.memory_space<vmem>>, %arg3: memref<64x256xf32, #tpu.memory_space<vmem>>, %arg4: memref<2x256xf32, #tpu.memory_space<vmem>>, %arg5: memref<16x256xf32, #tpu.memory_space<vmem>>, %arg6: memref<16x256xf32, #tpu.memory_space<vmem>>) attributes {dimension_semantics = [#tpu.dimension_semantics<parallel>, #tpu.dimension_semantics<arbitrary>], iteration_bounds = array<i64: 1, 1>, scalar_prefetch = 0 : i64, scratch_operands = 1 : i64, tpu.core_type = #tpu.core_type<tc>, window_params = [{transform_indices = @transform_0, window_bounds = array<i64: 16, 64>}, {transform_indices = @transform_1, window_bounds = array<i64: 64, 256>}, {transform_indices = @transform_2, window_bounds = array<i64: 2, 256>}, {transform_indices = @transform_3, window_bounds = array<i64: 16, 256>}]} {
    %c0_i32 = arith.constant 0 : i32
    %0 = arith.cmpi eq, %arg1, %c0_i32 : i32
    %1 = arith.extui %0 : i1 to i32
    %c0_i32_0 = arith.constant 0 : i32
    %2 = arith.cmpi ne, %1, %c0_i32_0 : i32
    scf.if %2 {
      %cst_10 = arith.constant 0.000000e+00 : f32
      %12 = vector.broadcast %cst_10 : f32 to vector<16x256xf32>
      %c0_11 = arith.constant 0 : index
      %c0_12 = arith.constant 0 : index
      %13 = vector.load %arg6[%c0_11, %c0_12] : memref<16x256xf32, #tpu.memory_space<vmem>>, vector<16x256xf32>
      tpu.vector_store %arg6[%c0_11, %c0_12], %12 {strides = array<i32>} : memref<16x256xf32, #tpu.memory_space<vmem>>, vector<16x256xf32>,
    } else {
    }
    %c0 = arith.constant 0 : index
    %c0_1 = arith.constant 0 : index
    %3 = vector.load %arg6[%c0, %c0_1] : memref<16x256xf32, #tpu.memory_space<vmem>>, vector<16x256xf32>
    %c0_2 = arith.constant 0 : index
    %c0_3 = arith.constant 0 : index
    %4 = vector.load %arg2[%c0_2, %c0_3] : memref<16x64xf32, #tpu.memory_space<vmem>>, vector<16x64xf32>
    %c0_4 = arith.constant 0 : index
    %c0_5 = arith.constant 0 : index
    %5 = vector.load %arg3[%c0_4, %c0_5] : memref<64x256xf32, #tpu.memory_space<vmem>>, vector<64x256xf32>
    %cst = arith.constant dense<0.000000e+00> : vector<16x256xf32>
    %6 = tpu.matmul %4, %5, %cst {dimension_numbers = #tpu.dot_dimension_numbers<[1], [0], [0], [1], [0, 0, 1, 1], [], []>} : vector<16x64xf32>, vector<64x256xf32>, vector<16x256xf32> -> vector<16x256xf32>
    %7 = arith.addf %3, %6 : vector<16x256xf32>
    %c0_6 = arith.constant 0 : index
    %c0_7 = arith.constant 0 : index
    %8 = vector.load %arg6[%c0_6, %c0_7] : memref<16x256xf32, #tpu.memory_space<vmem>>, vector<16x256xf32>
    tpu.vector_store %arg6[%c0_6, %c0_7], %7 {strides = array<i32>} : memref<16x256xf32, #tpu.memory_space<vmem>>, vector<16x256xf32>,
    %c0_i32_8 = arith.constant 0 : i32
    %9 = arith.cmpi eq, %arg1, %c0_i32_8 : i32
    %10 = arith.extui %9 : i1 to i32
    %c0_i32_9 = arith.constant 0 : i32
    %11 = arith.cmpi ne, %10, %c0_i32_9 : i32
    scf.if %11 {
      %c0_10 = arith.constant 0 : index
      %c0_11 = arith.constant 0 : index
      %12 = vector.load %arg6[%c0_10, %c0_11] : memref<16x256xf32, #tpu.memory_space<vmem>>, vector<16x256xf32>
      %cst_12 = arith.constant dense<0.000000e+00> : vector<256xf32>
      %13 = vector.multi_reduction <add>, %12, %cst_12 [0] : vector<16x256xf32> to vector<256xf32>
      %14 = vector.shape_cast %13 : vector<256xf32> to vector<1x256xf32>
      %cst_13 = arith.constant 1.600000e+01 : f32
      %15 = vector.broadcast %cst_13 : f32 to vector<1x256xf32>
      %16 = arith.divf %14, %15 : vector<1x256xf32>
      %17 = arith.mulf %12, %12 : vector<16x256xf32>
      %cst_14 = arith.constant dense<0.000000e+00> : vector<256xf32>
      %18 = vector.multi_reduction <add>, %17, %cst_14 [0] : vector<16x256xf32> to vector<256xf32>
      %19 = vector.shape_cast %18 : vector<256xf32> to vector<1x256xf32>
      %cst_15 = arith.constant 1.600000e+01 : f32
      %20 = vector.broadcast %cst_15 : f32 to vector<1x256xf32>
      %21 = arith.divf %19, %20 : vector<1x256xf32>
      %22 = arith.mulf %16, %16 : vector<1x256xf32>
      %23 = arith.subf %21, %22 : vector<1x256xf32>
      %cst_16 = arith.constant 0.000000e+00 : f32
      %24 = vector.broadcast %cst_16 : f32 to vector<1x256xf32>
      %25 = arith.maximumf %23, %24 : vector<1x256xf32>
      %c0_17 = arith.constant 0 : index
      %c0_18 = arith.constant 0 : index
      %26 = vector.load %arg4[%c0_17, %c0_18] : memref<2x256xf32, #tpu.memory_space<vmem>>, vector<1x256xf32>
      %c1 = arith.constant 1 : index
      %c0_19 = arith.constant 0 : index
      %27 = vector.load %arg4[%c1, %c0_19] : memref<2x256xf32, #tpu.memory_space<vmem>>, vector<1x256xf32>
      %cst_20 = arith.constant 9.99999974E-6 : f32
      %28 = vector.broadcast %cst_20 : f32 to vector<1x256xf32>
      %29 = arith.addf %25, %28 : vector<1x256xf32>
      %30 = math.rsqrt %29 : vector<1x256xf32>
      %31 = arith.mulf %26, %30 : vector<1x256xf32>
      %32 = arith.mulf %16, %31 : vector<1x256xf32>
      %33 = arith.subf %27, %32 : vector<1x256xf32>
      %34 = vector.broadcast %31 : vector<1x256xf32> to vector<16x256xf32>
      %35 = arith.mulf %12, %34 : vector<16x256xf32>
      %36 = vector.broadcast %33 : vector<1x256xf32> to vector<16x256xf32>
      %37 = arith.addf %35, %36 : vector<16x256xf32>
      %cst_21 = arith.constant 0.000000e+00 : f32
      %38 = vector.broadcast %cst_21 : f32 to vector<16x256xf32>
      %39 = arith.cmpf oge, %37, %38 : vector<16x256xf32>
      %cst_22 = arith.constant 2.000000e-01 : f32
      %40 = vector.broadcast %cst_22 : f32 to vector<16x256xf32>
      %41 = arith.mulf %40, %37 : vector<16x256xf32>
      %42 = arith.select %39, %37, %41 : vector<16x256xi1>, vector<16x256xf32>
      %c0_23 = arith.constant 0 : index
      %c0_24 = arith.constant 0 : index
      %43 = vector.load %arg5[%c0_23, %c0_24] : memref<16x256xf32, #tpu.memory_space<vmem>>, vector<16x256xf32>
      tpu.vector_store %arg5[%c0_23, %c0_24], %42 {strides = array<i32>} : memref<16x256xf32, #tpu.memory_space<vmem>>, vector<16x256xf32>,
    } else {
    }
    return
  }
  func.func @transform_0(%arg0: i32, %arg1: i32) -> (i32, i32) {
    %c0_i32 = arith.constant 0 : i32
    %c0_i32_0 = arith.constant 0 : i32
    return %c0_i32, %arg1 : i32, i32
  }
  func.func @transform_1(%arg0: i32, %arg1: i32) -> (i32, i32) {
    %c0_i32 = arith.constant 0 : i32
    return %arg1, %arg0 : i32, i32
  }
  func.func @transform_2(%arg0: i32, %arg1: i32) -> (i32, i32) {
    %c0_i32 = arith.constant 0 : i32
    %c0_i32_0 = arith.constant 0 : i32
    return %c0_i32, %arg0 : i32, i32
  }
  func.func @transform_3(%arg0: i32, %arg1: i32) -> (i32, i32) {
    %c0_i32 = arith.constant 0 : i32
    %c0_i32_0 = arith.constant 0 : i32
    return %c0_i32, %arg0 : i32, i32
  }
}

</mosaic_0001>

<bundles_post_ra>
// kernel: tpu_custom_call.1
= control target key start
LH: loop header
LB: loop body
LE: loop exit
PB: predicated region body
PF: predicated region fallthrough
CT: control target
= control target key end

     0   :  { %8 = vsyncpa [#allocation4], 0  ;;  %s509_s0 = inlined_call_operand.hbm [shape: f32[16,64], index: 0, kind: input, shape index: {}]   ;;  %s510_s1 = inlined_call_operand.hbm [shape: f32[64,256], index: 1, kind: input, shape index: {}]   ;;  %s511_s2 = inlined_call_operand.hbm [shape: f32[2,256], index: 2, kind: input, shape index: {}]   ;;  %s512_s3 = inlined_call_operand.hbm [shape: f32[16,256], index: 3, kind: output, shape index: {}]  }
   0x1   :  { %9 = vsyncpa [#allocation7], 0  ;;  %s28_s14 = sshll.u32 %s510_s1, 4  ;;  %s29_s14 = int_to_ptr.hbm [resolvable:$true] %s28_s14 }
   0x2   :  { %10 = vsyncpa [#allocation5], 0  ;;  %s438_s15 = smov [#allocation6]   ;;  %s15_s19 = sshll.u32 %s509_s0, 4  ;;  %s16_s19 = int_to_ptr.hbm [resolvable:$true] %s15_s19 }
   0x3   :  { %s30_s16 = sshll.u32 %s438_s15, 4  ;;  %s439_s20 = smov 256   ;;  %s31_s16 = int_to_ptr.vmem [resolvable:$true] %s30_s16 }
   0x4   :  { %s440_s21 = smov 16   ;;  %s441_s22 = smov [#allocation3]  }
   0x5   :  { %36 = dma.hbm_to_vmem [thread:$0]  %s29_s14, 2048, %s31_s16, [#allocation7], %s439_s20, %s439_s20, %s440_s21  }
   0x6   :  { %s17_s23 = sshll.u32 %s441_s22, 4  ;;  %s442_s1 = smov 128   ;;  %s18_s23 = int_to_ptr.vmem [resolvable:$true] %s17_s23 }
   0x7   :  { %s443_s24 = smov 8   ;;  %s42_s27 = sshll.u32 %s511_s2, 4  ;;  %s43_s27 = int_to_ptr.hbm [resolvable:$true] %s42_s27 }
   0x8   :  { %23 = dma.hbm_to_vmem [thread:$0]  %s16_s19, 256, %s18_s23, [#allocation4], %s442_s1, %s442_s1, %s443_s24  }
   0x9   :  { %s444_s28 = smov [#allocation8]  }
   0xa   :  { %s44_s0 = sshll.u32 %s444_s28, 4  ;;  %s45_s0 = int_to_ptr.vmem [resolvable:$true] %s44_s0 }
   0xb   :  { %47 = dma.hbm_to_vmem [thread:$0]  %s43_s27, 64, %s45_s0, [#allocation7]  }
   0xc   :  { %432 = dma.done.wait [#allocation4], 256  }
   0xd   :  { %433 = vsyncadd [#allocation4], 4294967040 }
   0xe   :  { %434 = dma.done.wait [#allocation7], 2112  }
   0xf   :  { %435 = vsyncadd [#allocation7], 4294965184  ;;  %v88_v0 = vld [vmem:[#allocation6 + $0x70] sm:$0xff]  ;;  %v89_v1 = vld [vmem:[#allocation6 + $0x78] sm:$0xff]  ;;  %vm90_vm0 = vcmask 523264   ;;  %v445_v18 = vmov 16.0  }
  0x10   :  { %v86_v2 = vld [vmem:[#allocation6 + $0x60] sm:$0xff]  ;;  %305 = vmatpush.msra.mxu2 %v88_v0  ;;  %313 = vmatpush.msra.mxu3 %v89_v1  ;;  %v87_v3 = vld [vmem:[#allocation6 + $0x68] sm:$0xff]  ;;  %v84_v4 = vld [vmem:[#allocation6 + $0x50] sm:$0xff]  ;;  %330 = vrcp.f32 %v445_v18  ;;  %vm235_vm7 = vcmask 1040384   ;;  %s446_s2 = smov [#allocation9]   ;;  %s287_s5 = sshll.u32 %s512_s3, 4  ;;  %s288_s5 = int_to_ptr.hbm [resolvable:$true] %s287_s5 }
  0x11   :  { %v85_v5 = vld [vmem:[#allocation6 + $0x58] sm:$0xff]  ;;  %105 = vmatpush.msra.mxu0 %v88_v0  ;;  %128 = vmatpush.msra.mxu1 %v89_v1  ;;  %v82_v6 = vld [vmem:[#allocation6 + $0x40] sm:$0xff]  ;;  %v83_v7 = vld [vmem:[#allocation6 + $0x48] sm:$0xff]  ;;  %s285_s29 = sshll.u32 %s446_s2, 4  ;;  %s286_s29 = int_to_ptr.vmem [resolvable:$true] %s285_s29 }
  0x12   :  { %306 = vmatpush.msra.mxu2 %v86_v2  ;;  %314 = vmatpush.msra.mxu3 %v87_v3  ;;  %v80_v8 = vld [vmem:[#allocation6 + $0x30] sm:$0xff]  ;;  %v81_v9 = vld [vmem:[#allocation6 + $0x38] sm:$0xff]  ;;  %v78_v10 = vld [vmem:[#allocation6 + $0x20] sm:$0xff] }
  0x13   :  { %106 = vmatpush.msra.mxu0 %v86_v2  ;;  %129 = vmatpush.msra.mxu1 %v87_v3  ;;  %v79_v11 = vld [vmem:[#allocation6 + $0x28] sm:$0xff]  ;;  %v76_v12 = vld [vmem:[#allocation6 + $0x10] sm:$0xff]  ;;  %v77_v13 = vld [vmem:[#allocation6 + $0x18] sm:$0xff] }
  0x14   :  { %307 = vmatpush.msra.mxu2 %v84_v4  ;;  %315 = vmatpush.msra.mxu3 %v85_v5  ;;  %v74_v14 = vld [vmem:[#allocation6] sm:$0xff]  ;;  %v75_v15 = vld [vmem:[#allocation6 + $0x8] sm:$0xff]  ;;  %v73_v16 = vld [vmem:[#allocation3 + $0x8] sm:$0xff] }
  0x15   :  { %107 = vmatpush.msra.mxu0 %v84_v4  ;;  %130 = vmatpush.msra.mxu1 %v85_v5  ;;  %v72_v17 = vld [vmem:[#allocation3] sm:$0xff] }
  0x16   :  { %308 = vmatpush.msra.mxu2 %v82_v6  ;;  %316 = vmatpush.msra.mxu3 %v83_v7  ;;  %v331_v19 = vpop.eup %330 }
  0x17   :  { %108 = vmatpush.msra.mxu0 %v82_v6  ;;  %131 = vmatpush.msra.mxu1 %v83_v7  ;;  %v173_v21 = vmul.f32 16.0, %v331_v19  ;;  %vm177_vm1 = vweird.f32 %v331_v19 }
  0x18   :  { %309 = vmatpush.msra.mxu2 %v80_v8  ;;  %317 = vmatpush.msra.mxu3 %v81_v9 }
  0x19   :  { %109 = vmatpush.msra.mxu0 %v80_v8  ;;  %132 = vmatpush.msra.mxu1 %v81_v9  ;;  %v174_v26 = vsub.f32 1.0, %v173_v21 }
  0x1a   :  { %310 = vmatpush.msra.mxu2 %v78_v10  ;;  %318 = vmatpush.msra.mxu3 %v79_v11 }
  0x1b   :  { %110 = vmatpush.msra.mxu0 %v78_v10  ;;  %133 = vmatpush.msra.mxu1 %v79_v11  ;;  %v175_v36 = vmul.f32 %v331_v19, %v174_v26 }
  0x1c   :  { %311 = vmatpush.msra.mxu2 %v76_v12  ;;  %319 = vmatpush.msra.mxu3 %v77_v13 }
  0x1d   :  { %111 = vmatpush.msra.mxu0 %v76_v12  ;;  %134 = vmatpush.msra.mxu1 %v77_v13  ;;  %v176_v45 = vadd.f32 %v331_v19, %v175_v36 }
  0x1e   :  { %312 = vmatpush.msra.mxu2 %v74_v14  ;;  %320 = vmatpush.msra.mxu3 %v75_v15 }
  0x1f   :  { %302 = vmatmul.msk.f32.vlgmr.msra.gmra.mxu2 %vm90_vm0, %v73_v16  ;;  %304 = vmatmul.msk.f32.vlgmr.msra.gmra.mxu3 %vm90_vm0, %v73_v16  ;;  %v178_v54 = vsel %vm177_vm1, %v331_v19, %v176_v45 }
  0x20   :  { %112 = vmatpush.msra.mxu0 %v74_v14  ;;  %135 = vmatpush.msra.mxu1 %v75_v15 }
  0x21   :  { %301 = vmatmul.msk.f32.vlgmr.msra.gmra.mxu0 %vm90_vm0, %v72_v17  ;;  %303 = vmatmul.msk.f32.vlgmr.msra.gmra.mxu1 %vm90_vm0, %v72_v17 }
  0x9e   :  { %v479_v20 = vpop.f32.mrf.mxu0  ;;  %v481_v22 = vpop.f32.mrf.mxu1 }
  0x9f   :  { %v181_v23 = vmul.f32 %v479_v20, %v479_v20  ;;  %v182_v24 = vmul.f32 %v481_v22, %v481_v22 }
  0xa2   :  { %v487_v25 = vpop.f32.mrf.mxu2  ;;  %v489_v27 = vpop.f32.mrf.mxu3 }
  0xa3   :  { %v158_v28 = vadd.f32 %v487_v25, %v479_v20  ;;  %v183_v29 = vmul.f32 %v487_v25, %v487_v25  ;;  %v165_v30 = vadd.f32 %v489_v27, %v481_v22  ;;  %v184_v31 = vmul.f32 %v489_v27, %v489_v27 }
  0xa5   :  { %v159_v32 = vrot.slane %v158_v28, 4  ;;  %v185_v33 = vadd.f32 %v183_v29, %v181_v23  ;;  %v166_v34 = vrot.slane %v165_v30, 4  ;;  %v192_v35 = vadd.f32 %v184_v31, %v182_v24  ;;  %v207_v24 = vld [vmem:[#allocation8] ss:$2 sm:$0x3] }
  0xa7   :  { %v160_v37 = vadd.f32 %v159_v32, %v158_v28  ;;  %v186_v38 = vrot.slane %v185_v33, 4  ;;  %v167_v39 = vadd.f32 %v166_v34, %v165_v30  ;;  %v193_v40 = vrot.slane %v192_v35, 4  ;;  %v209_v34 = vld [vmem:[#allocation8 + $0x1] ss:$2 sm:$0x3] }
  0xa9   :  { %v161_v41 = vrot.slane %v160_v37, 2  ;;  %v187_v42 = vadd.f32 %v186_v38, %v185_v33  ;;  %v168_v43 = vrot.slane %v167_v39, 2  ;;  %v194_v44 = vadd.f32 %v193_v40, %v192_v35 }
  0xab   :  { %v162_v46 = vadd.f32 %v161_v41, %v160_v37  ;;  %v188_v47 = vrot.slane %v187_v42, 2  ;;  %v169_v48 = vadd.f32 %v168_v43, %v167_v39  ;;  %v195_v49 = vrot.slane %v194_v44, 2 }
  0xad   :  { %v163_v50 = vrot.slane %v162_v46, 1  ;;  %v189_v51 = vadd.f32 %v188_v47, %v187_v42  ;;  %v170_v52 = vrot.slane %v169_v48, 1  ;;  %v196_v53 = vadd.f32 %v195_v49, %v194_v44 }
  0xaf   :  { %v164_v55 = vadd.f32 %v163_v50, %v162_v46  ;;  %v190_v56 = vrot.slane %v189_v51, 1  ;;  %v171_v57 = vadd.f32 %v170_v52, %v169_v48  ;;  %v197_v58 = vrot.slane %v196_v53, 1 }
  0xb1   :  { %v179_v59 = vmul.f32 %v178_v54, %v164_v55  ;;  %v191_v60 = vadd.f32 %v190_v56, %v189_v51  ;;  %v180_v61 = vmul.f32 %v178_v54, %v171_v57  ;;  %v198_v62 = vadd.f32 %v197_v58, %v196_v53 }
  0xb3   :  { %v199_v63 = vmul.f32 %v191_v60, %v178_v54  ;;  %v201_v0 = vmul.f32 %v179_v59, %v179_v59  ;;  %v200_v1 = vmul.f32 %v198_v62, %v178_v54  ;;  %v202_v2 = vmul.f32 %v180_v61, %v180_v61 }
  0xb5   :  { %v203_v3 = vsub.f32 %v199_v63, %v201_v0  ;;  %v204_v4 = vsub.f32 %v200_v1, %v202_v2 }
  0xb7   :  { %v205_v5 = vmax.f32 %v203_v3, 0.0  ;;  %v206_v6 = vmax.f32 %v204_v4, 0.0 }
  0xb9   :  { %v210_v7 = vadd.f32 1e-05, %v205_v5  ;;  %v211_v8 = vadd.f32 1e-05, %v206_v6 }
  0xbb   :  { %332 = vrsqrt.f32 %v210_v7  ;;  %vm228_vm4 = vweird.f32 %v211_v8  ;;  %vm218_vm6 = vweird.f32 %v210_v7 }
  0xbc   :  { %334 = vrsqrt.f32 %v211_v8 }
  0xc1   :  { %v333_v9 = vpop.eup %332 }
  0xc2   :  { %v335_v10 = vpop.eup %334  ;;  %v213_v11 = vmul.f32 %v333_v9, %v210_v7  ;;  %vm219_vm3 = vweird.f32 %v333_v9 }
  0xc3   :  { %v223_v12 = vmul.f32 %v335_v10, %v211_v8  ;;  %vm229_vm2 = vweird.f32 %v335_v10  ;;  %vm220_vm8 = vmor %vm218_vm6, %vm219_vm3 }
  0xc4   :  { %v214_v13 = vmul.f32 %v333_v9, %v213_v11  ;;  %vm230_vm5 = vmor %vm228_vm4, %vm229_vm2 }
  0xc5   :  { %v224_v14 = vmul.f32 %v335_v10, %v223_v12 }
  0xc6   :  { %v215_v15 = vmul.f32 0.5, %v214_v13 }
  0xc7   :  { %v225_v16 = vmul.f32 0.5, %v224_v14 }
  0xc8   :  { %v216_v17 = vsub.f32 1.5, %v215_v15 }
  0xc9   :  { %v226_v18 = vsub.f32 1.5, %v225_v16 }
  0xca   :  { %v217_v19 = vmul.f32 %v333_v9, %v216_v17 }
  0xcb   :  { %v227_v21 = vmul.f32 %v335_v10, %v226_v18 }
  0xcc   :  { %v221_v28 = vsel %vm220_vm8, %v333_v9, %v217_v19 }
  0xcd   :  { %v231_v23 = vsel %vm230_vm5, %v335_v10, %v227_v21 }
  0xce   :  { %v234_v26 = vrot.slane %v231_v23, 7 }
  0xd0   :  { %v236_v29 = vsel %vm235_vm7, %v221_v28, %v234_v26 }
  0xd1   :  { %v238_v30 = vmul.f32 %v236_v29, %v207_v24 }
  0xd3   :  { %v240_v31 = vperm.slane %v238_v30, 0  ;;  %v241_v32 = vperm.slane %v238_v30, 1 }
  0xd5   :  { %v245_v33 = vmul.f32 %v241_v32, %v180_v61  ;;  %v244_v35 = vmul.f32 %v240_v31, %v179_v59  ;;  %v252_v39 = vmul.f32 %v240_v31, %v479_v20  ;;  %v253_v40 = vmul.f32 %v241_v32, %v481_v22 }
  0xd6   :  { %v254_v41 = vmul.f32 %v240_v31, %v487_v25  ;;  %v255_v42 = vmul.f32 %v241_v32, %v489_v27 }
  0xd7   :  { %v248_v36 = vrot.slane %v245_v33, 7 }
  0xd9   :  { %v249_v37 = vsel %vm235_vm7, %v244_v35, %v248_v36 }
  0xda   :  { %v251_v38 = vsub.f32 %v209_v34, %v249_v37 }
  0xdc   :  { %v257_v43 = vperm.slane %v251_v38, 0  ;;  %v258_v44 = vperm.slane %v251_v38, 1 }
  0xde   :  { %v261_v45 = vadd.f32 %v257_v43, %v252_v39  ;;  %v262_v46 = vadd.f32 %v258_v44, %v253_v40  ;;  %v263_v47 = vadd.f32 %v257_v43, %v254_v41  ;;  %v264_v48 = vadd.f32 %v258_v44, %v255_v42 }
  0xe0   :  { %vm266_vm9 = vcmp.ge.f32.partialorder %v262_v46, 0.0  ;;  %vm268_vm10 = vcmp.ge.f32.partialorder %v264_v48, 0.0  ;;  %v269_v20 = vmul.f32 0.2, %v261_v45  ;;  %v270_v22 = vmul.f32 0.2, %v262_v46 }
  0xe1   :  { %v271_v49 = vmul.f32 0.2, %v263_v47  ;;  %v272_v25 = vmul.f32 0.2, %v264_v48  ;;  %vm265_vm11 = vcmp.ge.f32.partialorder %v261_v45, 0.0  ;;  %vm267_vm12 = vcmp.ge.f32.partialorder %v263_v47, 0.0 }
  0xe2   :  { %v274_v27 = vsel %vm266_vm9, %v262_v46, %v270_v22  ;;  %v273_v50 = vsel %vm265_vm11, %v261_v45, %v269_v20 }
  0xe3   :  { %v276_v51 = vsel %vm268_vm10, %v264_v48, %v272_v25  ;;  %278 = vst [vmem:[#allocation9 + $0x8] sm:$0xff] %v274_v27  ;;  %v275_v52 = vsel %vm267_vm12, %v263_v47, %v271_v49 }
  0xe4   :  { %280 = vst [vmem:[#allocation9 + $0x18] sm:$0xff] %v276_v51 }
  0xe5   :  { %277 = vst [vmem:[#allocation9] sm:$0xff] %v273_v50 }
  0xe6   :  { %279 = vst [vmem:[#allocation9 + $0x10] sm:$0xff] %v275_v52 }
  0xe7   :  { %293 = dma.vmem_to_hbm [thread:$0]  %s286_s29, 512, %s288_s5, [#allocation5], %s439_s20, %s439_s20, %s440_s21  }
  0xe8   :  { %436 = dma.done.wait [#allocation5], 512  }
  0xe9   :  { %437 = vsyncadd [#allocation5], 4294966784 }
  0xea   :  { %298 = vsyncpa [#allocation4], 1 }
  0xeb   :  { %299 = vsyncpa [#allocation7], 1 }
  0xec   :  { %300 = vsyncpa [#allocation5], 1 }

</bundles_post_ra>
